<compile_context>
chip_gen: v5e
topology: v5e:2x2
jax: 0.10.0
libtpu: 0.0.40
codegen_flags: <defaults>
</compile_context>

<pallas_src>
import math
import functools

import jax
import jax.numpy as jnp
from jax.experimental import pallas as pl
from jax.experimental.pallas import tpu as pltpu


def _round_up(a, b):
    return (a + b - 1) // b * b


def _vmem_capacity_bytes():
    """Per-core VMEM capacity (bytes), with conservative fallbacks."""
    try:
        v = int(pltpu.get_tpu_info().vmem_capacity_bytes)
        if v > 0:
            return v
    except Exception:
        pass
    try:
        kind = jax.devices()[0].device_kind.lower()
    except Exception:
        kind = ""
    if "v7" in kind:
        return 64 << 20
    if "v5" in kind or "v6" in kind:
        return 128 << 20
    return 64 << 20  # conservative default


def _ff_kernel(x_ref, w1_ref, b1_ref, w2_ref, b2_ref, o_ref, acc_ref, *, hk):
    k = pl.program_id(1)

    @pl.when(k == 0)
    def _init():
        # Fold b2 into the accumulator init; finalize then only casts.
        acc_ref[...] = jnp.broadcast_to(b2_ref[...], acc_ref.shape)

    # First linear on this hidden chunk: (tm, dim) @ (dim, hk) -> f32.
    h = jnp.dot(x_ref[...], w1_ref[...], preferred_element_type=jnp.float32)
    # b1 stays resident as one (1, hidden_p) block; slice the current chunk.
    start = pl.multiple_of(k * hk, 128)
    h = h + b1_ref[:, pl.ds(start, hk)]
    # Exact GELU in f32 (matches torch.nn.GELU default, approximate='none').
    h = 0.5 * h * (1.0 + jax.lax.erf(h * (1.0 / math.sqrt(2.0))))
    # Second linear chunk contribution, accumulated in f32 VMEM.
    acc_ref[...] += jnp.dot(h.astype(w2_ref.dtype), w2_ref[...],
                            preferred_element_type=jnp.float32)

    @pl.when(k == pl.num_programs(1) - 1)
    def _finalize():
        o_ref[...] = acc_ref[...].astype(o_ref.dtype)


def _shrink_hk(hk, hidden_p):
    """Largest multiple of 128 that is < hk and divides hidden_p."""
    for cand in range(hk - 128, 127, -128):
        if hidden_p % cand == 0:
            return cand
    return 128


def _feed_forward_impl(x, w1_p, b1_p, w2_p, b2_p, *, dim, dim_p, hidden_p, hk,
                       compute_dtype, vmem_cap):
    orig_shape = x.shape
    out_dtype = x.dtype
    x2d = x.reshape(-1, dim)
    M = x2d.shape[0]

    budget = vmem_cap * 3 // 4  # ~48 MiB on v7x, ~96 MiB on v5e/v6e
    c_it = jnp.dtype(compute_dtype).itemsize
    o_it = jnp.dtype(out_dtype).itemsize

    # ---- row-tile selection (all static at trace time) -------------------
    tm_wish = 1024 if (budget >= (80 << 20) and M >= 2048) else 512
    tm = _round_up(min(tm_wish, _round_up(M, 8)), 8)
    # Megacore: prefer >= 2 row tiles so both TensorCores get work on small M.
    if M > 8 and _round_up(M, tm) // tm < 2:
        tm = max(8, _round_up(tm // 2, 8))

    def footprint(tm_, hk_):
        return (2 * tm_ * dim_p * c_it          # x (double-buffered)
                + 2 * dim_p * hk_ * c_it        # W1 chunk
                + 2 * hk_ * dim_p * c_it        # W2 chunk
                + 2 * hidden_p * 4              # b1 (f32)
                + 2 * dim_p * 4                 # b2 (f32)
                + 2 * tm_ * dim_p * o_it        # out
                + tm_ * dim_p * 4)              # f32 accumulator

    while footprint(tm, hk) > budget and tm > 128:
        tm = max(128, _round_up(tm // 2, 8))
    while footprint(tm, hk) > budget and hk > 128:
        hk = _shrink_hk(hk, hidden_p)

    M_p = _round_up(M, tm)

    # ---- pad / cast x only when needed ------------------------------------
    if (M_p, dim_p) != (M, dim) or x2d.dtype != compute_dtype:
        x_p = jnp.zeros((M_p, dim_p), compute_dtype).at[:M, :dim].set(
            x2d.astype(compute_dtype))
    else:
        x_p = x2d

    grid = (M_p // tm, hidden_p // hk)
    n_row_tiles = grid[0]

    cost = pl.CostEstimate(
        flops=2 * 2 * M_p * dim_p * hidden_p,              # two matmuls
        transcendentals=M_p * hidden_p,                    # erf per hidden activation
        bytes_accessed=(M_p * dim_p * c_it                                # x
                        + 2 * n_row_tiles * dim_p * hidden_p * c_it       # W1+W2 per row tile
                        + M_p * dim_p * o_it),                            # out
    )

    out = pl.pallas_call(
        functools.partial(_ff_kernel, hk=hk),
        out_shape=jax.ShapeDtypeStruct((M_p, dim_p), out_dtype),
        grid_spec=pltpu.PrefetchScalarGridSpec(
            num_scalar_prefetch=0,
            grid=grid,
            in_specs=[
                pl.BlockSpec((tm, dim_p), lambda i, k: (i, 0)),      # x row tile
                pl.BlockSpec((dim_p, hk), lambda i, k: (0, k)),      # W1 hidden-chunk
                pl.BlockSpec((1, hidden_p), lambda i, k: (0, 0)),    # b1 (resident)
                pl.BlockSpec((hk, dim_p), lambda i, k: (k, 0)),      # W2 hidden-chunk
                pl.BlockSpec((1, dim_p), lambda i, k: (0, 0)),       # b2 (resident)
            ],
            out_specs=pl.BlockSpec((tm, dim_p), lambda i, k: (i, 0)),
            scratch_shapes=[pltpu.VMEM((tm, dim_p), jnp.float32)],   # f32 accumulator
        ),
        compiler_params=pltpu.CompilerParams(
            dimension_semantics=("parallel", "arbitrary"),
            vmem_limit_bytes=int(budget),
        ),
        cost_estimate=cost,
    )(x_p, w1_p, b1_p, w2_p, b2_p)

    if (M_p, dim_p) != (M, dim):
        out = out[:M, :dim]
    return out.reshape(orig_shape)


class FeedForwardPallas:
    """Pallas TPU FeedForward. Weights are padded/cast once at construction."""

    def __init__(self, w1, b1, w2, b2, *, compute_dtype=jnp.bfloat16, hk=512):
        dim, hidden = w1.shape
        assert w2.shape == (hidden, dim)
        assert hk % 128 == 0
        self.dim, self.hidden = dim, hidden

        # Lane-align dim; prefer a 256-multiple (v6e/v7x MXU width) when dim > 128.
        dim_p = _round_up(dim, 128)
        if dim_p > 128:
            dim_p = _round_up(dim, 256)
        # Pad hidden so the hidden chunk never degrades below hk (default 512).
        hidden_p = _round_up(hidden, 128)
        if hidden_p <= hk:
            hk = hidden_p
        else:
            hidden_p = _round_up(hidden_p, hk)
        self.dim_p, self.hidden_p, self.hk = dim_p, hidden_p, hk

        cd = compute_dtype
        # Pre-pad / pre-cast once, outside the per-call path (zero padding is exact:
        # gelu(0)=0 and zero weight rows/cols contribute nothing to kept outputs).
        self.w1_p = jnp.zeros((dim_p, hidden_p), cd).at[:dim, :hidden].set(w1.astype(cd))
        self.w2_p = jnp.zeros((hidden_p, dim_p), cd).at[:hidden, :dim].set(w2.astype(cd))
        self.b1_p = jnp.zeros((1, hidden_p), jnp.float32).at[0, :hidden].set(
            b1.astype(jnp.float32))
        self.b2_p = jnp.zeros((1, dim_p), jnp.float32).at[0, :dim].set(
            b2.astype(jnp.float32))

        self._fn = jax.jit(functools.partial(
            _feed_forward_impl, dim=dim, dim_p=dim_p, hidden_p=hidden_p, hk=hk,
            compute_dtype=cd, vmem_cap=_vmem_capacity_bytes()))

    def __call__(self, x):
        return self._fn(x, self.w1_p, self.b1_p, self.w2_p, self.b2_p)


def init_params(key, dim, hidden_dim, dtype=jnp.float32):
    """Deterministic init mimicking nn.Linear's uniform(-1/sqrt(fan_in), ...)."""
    k1, k2, k3, k4 = jax.random.split(key, 4)
    bound1 = 1.0 / math.sqrt(dim)
    bound2 = 1.0 / math.sqrt(hidden_dim)
    # Stored as (in_features, out_features) = transpose of PyTorch's (out, in).
    w1 = jax.random.uniform(k1, (dim, hidden_dim), dtype, -bound1, bound1)
    b1 = jax.random.uniform(k2, (hidden_dim,), dtype, -bound1, bound1)
    w2 = jax.random.uniform(k3, (hidden_dim, dim), dtype, -bound2, bound2)
    b2 = jax.random.uniform(k4, (dim,), dtype, -bound2, bound2)
    return w1, b1, w2, b2


def _gelu_exact(h):
    return 0.5 * h * (1.0 + jax.lax.erf(h / jnp.sqrt(2.0)))


def _reference_fp32(x, w1, b1, w2, b2):
    h = x @ w1 + b1
    return _gelu_exact(h) @ w2 + b2


def _reference_bf16(x, w1, b1, w2, b2):
    """Reference with the same bf16-input / f32-accumulate matmul recipe."""
    xb = x.astype(jnp.bfloat16)
    h = jnp.dot(xb, w1.astype(jnp.bfloat16), preferred_element_type=jnp.float32) + b1
    h = _gelu_exact(h)
    return jnp.dot(h.astype(jnp.bfloat16), w2.astype(jnp.bfloat16),
                   preferred_element_type=jnp.float32) + b2


if __name__ == "__main__":
    # Small shapes consistent with the module: batch=2, seq=8, dim=32, hidden=64.
    # TODO(synk): Dropout(p=0.0) is an identity and is omitted; p>0 training-mode
    # dropout would need pltpu PRNG and is outside this eval-mode forward.
    B, S, DIM, HIDDEN = 2, 8, 32, 64
    key = jax.random.PRNGKey(0)
    kx, kp = jax.random.split(key)
    x = jax.random.normal(kx, (B, S, DIM), jnp.float32)
    w1, b1, w2, b2 = init_params(kp, DIM, HIDDEN)

    ff = FeedForwardPallas(w1, b1, w2, b2)
    out = jax.block_until_ready(ff(x))
    assert out.shape == x.shape

    # Tight check against a reference using the same bf16-MXU / f32-accumulate recipe.
    ref_matched = _reference_bf16(x, w1, b1, w2, b2)
    assert jnp.allclose(out, ref_matched, atol=1e-3, rtol=1e-3), \
        "mismatch vs bf16-matched reference"

    # Loose check against the pure-f32 math (bf16 rounding tolerance).
    ref_f32 = _reference_fp32(x, w1, b1, w2, b2)
    assert jnp.allclose(out, ref_f32, atol=5e-2, rtol=5e-2), \
        "mismatch vs f32 reference"

    print("KERNEL_OK")
</pallas_src>

<mosaic_0001>
module attributes {stable_mosaic.version = 11 : i64} {
  func.func @_ff_kernel(%arg0: i32, %arg1: i32, %arg2: memref<8x128xbf16, #tpu.memory_space<vmem>>, %arg3: memref<128x128xbf16, #tpu.memory_space<vmem>>, %arg4: memref<1x128xf32, #tpu.memory_space<vmem>>, %arg5: memref<128x128xbf16, #tpu.memory_space<vmem>>, %arg6: memref<1x128xf32, #tpu.memory_space<vmem>>, %arg7: memref<8x128xf32, #tpu.memory_space<vmem>>, %arg8: memref<8x128xf32, #tpu.memory_space<vmem>>) attributes {dimension_semantics = [#tpu.dimension_semantics<parallel>, #tpu.dimension_semantics<arbitrary>], iteration_bounds = array<i64: 2, 1>, scalar_prefetch = 0 : i64, scratch_operands = 1 : i64, tpu.core_type = #tpu.core_type<tc>, window_params = [{transform_indices = @transform_0, window_bounds = array<i64: 8, 128>}, {transform_indices = @transform_1, window_bounds = array<i64: 128, 128>}, {pipeline_mode = #tpu.pipeline_mode<synchronous>, transform_indices = @transform_2, window_bounds = array<i64: 1, 128>}, {transform_indices = @transform_3, window_bounds = array<i64: 128, 128>}, {pipeline_mode = #tpu.pipeline_mode<synchronous>, transform_indices = @transform_4, window_bounds = array<i64: 1, 128>}, {transform_indices = @transform_5, window_bounds = array<i64: 8, 128>}]} {
    %c0_i32 = arith.constant 0 : i32
    %0 = arith.cmpi eq, %arg1, %c0_i32 : i32
    %1 = arith.extui %0 : i1 to i32
    %c0_i32_0 = arith.constant 0 : i32
    %2 = arith.cmpi ne, %1, %c0_i32_0 : i32
    scf.if %2 {
      %c0_17 = arith.constant 0 : index
      %c0_18 = arith.constant 0 : index
      %29 = vector.load %arg6[%c0_17, %c0_18] : memref<1x128xf32, #tpu.memory_space<vmem>>, vector<1x128xf32>
      %30 = vector.shape_cast %29 : vector<1x128xf32> to vector<1x128xf32>
      %31 = vector.broadcast %30 : vector<1x128xf32> to vector<8x128xf32>
      %c0_19 = arith.constant 0 : index
      %c0_20 = arith.constant 0 : index
      %32 = vector.load %arg8[%c0_19, %c0_20] : memref<8x128xf32, #tpu.memory_space<vmem>>, vector<8x128xf32>
      tpu.vector_store %arg8[%c0_19, %c0_20], %31 {strides = array<i32>} : memref<8x128xf32, #tpu.memory_space<vmem>>, vector<8x128xf32>,
    } else {
    }
    %c0 = arith.constant 0 : index
    %c0_1 = arith.constant 0 : index
    %3 = vector.load %arg2[%c0, %c0_1] : memref<8x128xbf16, #tpu.memory_space<vmem>>, vector<8x128xbf16>
    %c0_2 = arith.constant 0 : index
    %c0_3 = arith.constant 0 : index
    %4 = vector.load %arg3[%c0_2, %c0_3] : memref<128x128xbf16, #tpu.memory_space<vmem>>, vector<128x128xbf16>
    %cst = arith.constant dense<0.000000e+00> : vector<8x128xf32>
    %5 = tpu.matmul %3, %4, %cst {dimension_numbers = #tpu.dot_dimension_numbers<[1], [0], [0], [1], [0, 0, 1, 1], [], []>} : vector<8x128xbf16>, vector<128x128xbf16>, vector<8x128xf32> -> vector<8x128xf32>
    %c128_i32 = arith.constant 128 : i32
    %6 = arith.muli %arg1, %c128_i32 : i32
    %7 = tpu.assume_multiple %6, 128 : i32
    %c0_4 = arith.constant 0 : index
    %8 = arith.index_cast %7 : i32 to index
    %9 = vector.load %arg4[%c0_4, %8] : memref<1x128xf32, #tpu.memory_space<vmem>>, vector<1x128xf32>
    %10 = vector.broadcast %9 : vector<1x128xf32> to vector<8x128xf32>
    %11 = arith.addf %5, %10 : vector<8x128xf32>
    %cst_5 = arith.constant 5.000000e-01 : f32
    %12 = vector.broadcast %cst_5 : f32 to vector<8x128xf32>
    %13 = arith.mulf %12, %11 : vector<8x128xf32>
    %cst_6 = arith.constant 0.707106769 : f32
    %14 = vector.broadcast %cst_6 : f32 to vector<8x128xf32>
    %15 = arith.mulf %11, %14 : vector<8x128xf32>
    %16 = math.erf %15 : vector<8x128xf32>
    %cst_7 = arith.constant 1.000000e+00 : f32
    %17 = vector.broadcast %cst_7 : f32 to vector<8x128xf32>
    %18 = arith.addf %17, %16 : vector<8x128xf32>
    %19 = arith.mulf %13, %18 : vector<8x128xf32>
    %c0_8 = arith.constant 0 : index
    %c0_9 = arith.constant 0 : index
    %20 = vector.load %arg8[%c0_8, %c0_9] : memref<8x128xf32, #tpu.memory_space<vmem>>, vector<8x128xf32>
    %21 = arith.truncf %19 : vector<8x128xf32> to vector<8x128xbf16>
    %c0_10 = arith.constant 0 : index
    %c0_11 = arith.constant 0 : index
    %22 = vector.load %arg5[%c0_10, %c0_11] : memref<128x128xbf16, #tpu.memory_space<vmem>>, vector<128x128xbf16>
    %cst_12 = arith.constant dense<0.000000e+00> : vector<8x128xf32>
    %23 = tpu.matmul %21, %22, %cst_12 {dimension_numbers = #tpu.dot_dimension_numbers<[1], [0], [0], [1], [0, 0, 1, 1], [], []>} : vector<8x128xbf16>, vector<128x128xbf16>, vector<8x128xf32> -> vector<8x128xf32>
    %24 = arith.addf %20, %23 : vector<8x128xf32>
    %c0_13 = arith.constant 0 : index
    %c0_14 = arith.constant 0 : index
    %25 = vector.load %arg8[%c0_13, %c0_14] : memref<8x128xf32, #tpu.memory_space<vmem>>, vector<8x128xf32>
    tpu.vector_store %arg8[%c0_13, %c0_14], %24 {strides = array<i32>} : memref<8x128xf32, #tpu.memory_space<vmem>>, vector<8x128xf32>,
    %c0_i32_15 = arith.constant 0 : i32
    %26 = arith.cmpi eq, %arg1, %c0_i32_15 : i32
    %27 = arith.extui %26 : i1 to i32
    %c0_i32_16 = arith.constant 0 : i32
    %28 = arith.cmpi ne, %27, %c0_i32_16 : i32
    scf.if %28 {
      %c0_17 = arith.constant 0 : index
      %c0_18 = arith.constant 0 : index
      %29 = vector.load %arg8[%c0_17, %c0_18] : memref<8x128xf32, #tpu.memory_space<vmem>>, vector<8x128xf32>
      %c0_19 = arith.constant 0 : index
      %c0_20 = arith.constant 0 : index
      %30 = vector.load %arg7[%c0_19, %c0_20] : memref<8x128xf32, #tpu.memory_space<vmem>>, vector<8x128xf32>
      tpu.vector_store %arg7[%c0_19, %c0_20], %29 {strides = array<i32>} : memref<8x128xf32, #tpu.memory_space<vmem>>, vector<8x128xf32>,
    } else {
    }
    return
  }
  func.func @transform_0(%arg0: i32, %arg1: i32) -> (i32, i32) {
    %c0_i32 = arith.constant 0 : i32
    %c0_i32_0 = arith.constant 0 : i32
    return %arg0, %c0_i32 : i32, i32
  }
  func.func @transform_1(%arg0: i32, %arg1: i32) -> (i32, i32) {
    %c0_i32 = arith.constant 0 : i32
    %c0_i32_0 = arith.constant 0 : i32
    return %c0_i32, %arg1 : i32, i32
  }
  func.func @transform_2(%arg0: i32, %arg1: i32) -> (i32, i32) {
    %c0_i32 = arith.constant 0 : i32
    %c0_i32_0 = arith.constant 0 : i32
    %c0_i32_1 = arith.constant 0 : i32
    return %c0_i32, %c0_i32_0 : i32, i32
  }
  func.func @transform_3(%arg0: i32, %arg1: i32) -> (i32, i32) {
    %c0_i32 = arith.constant 0 : i32
    %c0_i32_0 = arith.constant 0 : i32
    return %arg1, %c0_i32 : i32, i32
  }
  func.func @transform_4(%arg0: i32, %arg1: i32) -> (i32, i32) {
    %c0_i32 = arith.constant 0 : i32
    %c0_i32_0 = arith.constant 0 : i32
    %c0_i32_1 = arith.constant 0 : i32
    return %c0_i32, %c0_i32_0 : i32, i32
  }
  func.func @transform_5(%arg0: i32, %arg1: i32) -> (i32, i32) {
    %c0_i32 = arith.constant 0 : i32
    %c0_i32_0 = arith.constant 0 : i32
    return %arg0, %c0_i32 : i32, i32
  }
}

</mosaic_0001>

<bundles_post_ra>
// kernel: _feed_forward_impl.1
= control target key start
LH: loop header
LB: loop body
LE: loop exit
PB: predicated region body
PF: predicated region fallthrough
CT: control target
= control target key end

     0   :  { %10 = vsyncpa [#allocation4], 0  ;;  %s943_s0 = inlined_call_operand.vmem [shape: bf16[16,128], index: 0, kind: input, shape index: {}]   ;;  %s944_s1 = inlined_call_operand.hbm [shape: bf16[128,128], index: 1, kind: input, shape index: {}]   ;;  %s945_s2 = inlined_call_operand.vmem [shape: f32[1,128], index: 2, kind: input, shape index: {}]   ;;  %s946_s3 = inlined_call_operand.hbm [shape: bf16[128,128], index: 3, kind: input, shape index: {}]   ;;  %s947_s4 = inlined_call_operand.vmem [shape: f32[1,128], index: 4, kind: input, shape index: {}]   ;;  %s948_s5 = inlined_call_operand.vmem [shape: f32[16,128], index: 5, kind: output, shape index: {}]  }
   0x1   :  { %11 = vsyncpa [#allocation6], 0  ;;  %s867_s18 = smov 0   ;;  %s869_s19 = smov 0  }
   0x2   :  { %s871_s20 = smov 0  }
   0x3 LB: > { %s596_s21 = sadd.s32 4294967295, %s831_s20   ;;  %s29_s22 = sadd.s32 1, %s827_s19  ;;  %s831_s20 = sphi %s871_s20, %s17_s20   ;;  %s827_s19 = sphi %s869_s19, %s952_s19   ;;  %s823_s18 = sphi %s867_s18, %s951_s18  }
   0x4   : > { %p31_p0 = scmp.ge.s32.totalorder %s29_s22, 2  ;;  %p598_p1 = scmp.ge.s32.totalorder %s831_s20, 1 }
   0x5   : > { %p180_p2 = scmp.lt.s32.totalorder %s831_s20, 3  ;;  %p892_p4 = scmp.eq.s32.totalorder %s596_s21, 0 }
   0x6   : > { %s954_s22 = smov (%p31_p0, %s29_s22), 0  ;;  %s193_s27 = sshll.u32 %s944_s1, 4  ;;  %s194_s27 = int_to_ptr.hbm [resolvable:$true] %s193_s27 }
   0x7   : > { %p888_p3 = pnand %p598_p1, %p180_p2  ;;  %s833_s28 = smov [#allocation3]  }
   0x8   : > { %s195_s29 = sshll.u32 %s833_s28, 4  ;;  %s213_s7 = sshll.u32 %s946_s3, 4  ;;  %s196_s29 = int_to_ptr.vmem [resolvable:$true] %s195_s29  ;;  %s214_s7 = int_to_ptr.hbm [resolvable:$true] %s213_s7 }
   0x9   : > { %p698_p5 = pneg %p888_p3  ;;  %s834_s8 = smov 64  }
   0xa   : > { %s835_s9 = smov 4   ;;  %s836_s10 = smov [#allocation5]  }
   0xb   : > { %p699_p6 = pnand %p892_p4, %p698_p5  ;;  %s215_s11 = sshll.u32 %s836_s10, 4  ;;  %s216_s11 = int_to_ptr.vmem [resolvable:$true] %s215_s11 }
   0xc   : > { %241 = sbr.rel (%p888_p3) target bundleno = 367 (0x16f), region = 40 }
   0xd   : > { %701 = dma.hbm_to_vmem [thread:$0]  (!%p699_p6), %s194_s27, 1024, %s196_s29, [#allocation4], %s834_s8, %s834_s8, %s835_s9  }
   0xe   : > { %704 = dma.hbm_to_vmem [thread:$0]  (!%p699_p6), %s214_s7, 1024, %s216_s11, [#allocation6], %s834_s8, %s834_s8, %s835_s9  }
  0x11   : > { %814 = dma.done.wait (%p892_p4), [#allocation4], 1024  }
  0x12   : > { %816 = vsyncadd (%p892_p4), [#allocation4], 4294966272 }
  0x13   : > { %818 = dma.done.wait (%p892_p4), [#allocation6], 1024  }
  0x14   : > { %820 = vsyncadd (%p892_p4), [#allocation6], 4294966272  ;;  %v681_v0 = vld [vmem:[#allocation3 + $0x38] sm:$0xff]  ;;  %v680_v1 = vld [vmem:[#allocation3 + $0x30] sm:$0xff]  ;;  %p273_p7 = scmp.lt.s32.totalorder %s823_s18, 1 }
  0x15   : > { %364 = vmatpush.bf16.msra.mxu0 %v681_v0  ;;  %v679_v2 = vld [vmem:[#allocation3 + $0x28] sm:$0xff]  ;;  %v678_v3 = vld [vmem:[#allocation3 + $0x20] sm:$0xff]  ;;  %v677_v4 = vld [vmem:[#allocation3 + $0x18] sm:$0xff] }
  0x16   : > { %v676_v5 = vld [vmem:[#allocation3 + $0x10] sm:$0xff]  ;;  %s956_s18 = smov (!%p273_p7, %s823_s18), 1  ;;  %v675_v6 = vld [vmem:[#allocation3 + $0x8] sm:$0xff]  ;;  %v674_v7 = vld [vmem:[#allocation3] sm:$0xff] }
  0x17   : > { %s605_s12 = sshll.u32 %s956_s18, 2  ;;  %v689_v9 = vld [vmem:[#allocation5 + $0x38] sm:$0xff]  ;;  %v688_v10 = vld [vmem:[#allocation5 + $0x30] sm:$0xff]  ;;  %v737_v11 = vld [vmem:[%s945_s2] ss:$0 sm:$0xff]  ;;  %s606_s21 = sshll.u32 %s956_s18, 3 }
  0x18   : > { %s276_s15 = scalar_lea.vmem %s943_s0, %s605_s12  ;;  %487 = vmatpush.bf16.msra.mxu1 %v689_v9  ;;  %v687_v12 = vld [vmem:[#allocation5 + $0x28] sm:$0xff]  ;;  %v686_v15 = vld [vmem:[#allocation5 + $0x20] sm:$0xff]  ;;  %v685_v18 = vld [vmem:[#allocation5 + $0x18] sm:$0xff]  ;;  %s281_s27 = scalar_lea.vmem %s948_s5, %s606_s21 }
  0x19   : > { %365 = vmatpush.bf16.msra.mxu0 %v680_v1  ;;  %v291_v8 = vld [vmem:[%s276_s15] sm:$0xf]  ;;  %v684_v22 = vld [vmem:[#allocation5 + $0x10] sm:$0xff]  ;;  %v683_v27 = vld [vmem:[#allocation5 + $0x8] sm:$0xff] }
  0x1a   : > { %v682_v31 = vld [vmem:[#allocation5] sm:$0xff] }
  0x1b   : > { %v738_v61 = vld [vmem:[%s947_s4] ss:$0 sm:$0xff] }
  0x1c   : > { %488 = vmatpush.bf16.msra.mxu1 %v688_v10 }
  0x1d   : > { %366 = vmatpush.bf16.msra.mxu0 %v679_v2 }
  0x20   : > { %489 = vmatpush.bf16.msra.mxu1 %v687_v12 }
  0x21   : > { %367 = vmatpush.bf16.msra.mxu0 %v678_v3 }
  0x24   : > { %490 = vmatpush.bf16.msra.mxu1 %v686_v15 }
  0x25   : > { %368 = vmatpush.bf16.msra.mxu0 %v677_v4 }
  0x28   : > { %491 = vmatpush.bf16.msra.mxu1 %v685_v18 }
  0x29   : > { %369 = vmatpush.bf16.msra.mxu0 %v676_v5 }
  0x2c   : > { %492 = vmatpush.bf16.msra.mxu1 %v684_v22 }
  0x2d   : > { %370 = vmatpush.bf16.msra.mxu0 %v675_v6 }
  0x30   : > { %493 = vmatpush.bf16.msra.mxu1 %v683_v27 }
  0x31   : > { %371 = vmatpush.bf16.msra.mxu0 %v674_v7 }
  0x34   : > { %372 = vmatmul.bf16.vlgmr.msra.gmra.mxu0 %v291_v8  ;;  %494 = vmatpush.bf16.msra.mxu1 %v682_v31 }
  0xb1   : > { %v373_v13 = vpop.f32.mrf.mxu0 }
  0xb2   : > { %v374_v14 = vadd.f32 %v737_v11, %v373_v13 }
  0xb4   : > { %v378_v16 = vmul.f32 0.70710677, %v374_v14  ;;  %v377_v57 = vmul.f32 0.5, %v374_v14 }
  0xb6   : > { %v379_v17 = vmul.f32 %v378_v16, %v378_v16 }
  0xb8   : > { %v380_v19 = vmin.f32 %v379_v17, 16.0 }
  0xb9   : > { %v375_v20 = vpop.f32.mrf.mxu0 }
  0xba   : > { %v381_v21 = vmul.f32 2.1237322e-06, %v380_v19  ;;  %v392_v23 = vmul.f32 3.8918573e-05, %v380_v19 }
  0xbc   : > { %v382_v24 = vadd.f32 0.00028619796, %v381_v21  ;;  %v393_v25 = vadd.f32 0.001143296, %v392_v23 }
  0xbe   : > { %v383_v26 = vmul.f32 %v382_v24, %v380_v19  ;;  %v394_v28 = vmul.f32 %v393_v25, %v380_v19 }
  0xc0   : > { %v395_v29 = vadd.f32 0.014752088, %v394_v28  ;;  %v384_v30 = vadd.f32 0.0036580483, %v383_v26 }
  0xc2   : > { %v396_v32 = vmul.f32 %v395_v29, %v380_v19  ;;  %v385_v34 = vmul.f32 %v384_v30, %v380_v19 }
  0xc4   : > { %v397_v33 = vadd.f32 0.112945676, %v396_v32  ;;  %v386_v37 = vadd.f32 0.05243302, %v385_v34 }
  0xc6   : > { %v398_v35 = vmul.f32 %v397_v33, %v380_v19  ;;  %v387_v40 = vmul.f32 %v386_v37, %v380_v19 }
  0xc8   : > { %v399_v36 = vadd.f32 0.4994258, %v398_v35  ;;  %v388_v41 = vadd.f32 0.18741608, %v387_v40 }
  0xca   : > { %v400_v38 = vmul.f32 %v399_v36, %v380_v19  ;;  %v389_v43 = vmul.f32 %v388_v41, %v380_v19 }
  0xcc   : > { %v401_v39 = vadd.f32 1.0, %v400_v38  ;;  %v390_v47 = vadd.f32 1.1283791, %v389_v43 }
  0xce   : > { %739 = vrcp.f32 %v401_v39  ;;  %v413_v46 = vand.u32 2147483648, %v401_v39  ;;  %v411_v49 = vand.u32 2147483647, %v401_v39  ;;  %vm407_vm1 = vweird.f32 %v401_v39 }
  0xcf   : > { %v391_v52 = vmul.f32 %v390_v47, %v378_v16 }
  0xd0   : > { %v414_v51 = vor.u32 1.1754944e-38, %v413_v46  ;;  %vm412_vm3 = vcmp.eq.f32.partialorder %v411_v49, 8.507059e+37 }
  0xd4   : > { %v740_v42 = vpop.eup %739 }
  0xd5   : > { %v403_v44 = vmul.f32 %v740_v42, %v401_v39  ;;  %vm408_vm0 = vweird.f32 %v740_v42 }
  0xd6   : > { %vm409_vm2 = vmor %vm407_vm1, %vm408_vm0 }
  0xd7   : > { %v404_v45 = vsub.f32 1.0, %v403_v44 }
  0xd9   : > { %v405_v48 = vmul.f32 %v740_v42, %v404_v45 }
  0xdb   : > { %v406_v50 = vadd.f32 %v740_v42, %v405_v48 }
  0xdd   : > { %v410_v53 = vsel %vm409_vm2, %v740_v42, %v406_v50 }
  0xde   : > { %v415_v54 = vsel %vm412_vm3, %v414_v51, %v410_v53 }
  0xdf   : > { %v416_v55 = vmul.f32 %v415_v54, %v391_v52 }
  0xe1   : > { %v639_v56 = vclamps-f32 %v416_v55, 1.0 }
  0xe3   : > { %v419_v58 = vadd.f32 1.0, %v639_v56 }
  0xe5   : > { %v420_v59 = vmul.f32 %v419_v58, %v377_v57 }
  0xe7   : > { %v422_v60 = vpack.c.bf16 %v420_v59, %v420_v59 }
  0xe9   : > { %495 = vmatmul.bf16.vlgmr.msra.gmra.mxu1 %v422_v60 }
 0x166   : > { %v496_v62 = vpop.f32.mrf.mxu1 }
 0x167   : > { %v500_v63 = vadd.f32 %v738_v61, %v496_v62 }
 0x169   : > { %506 = vst [vmem:[%s281_s27] sm:$0xff] %v500_v63 }
 0x16e   : > { %v498_v0 = vpop.f32.mrf.mxu1 }
 0x16f PF: > { %s17_s20 = sadd.s32 1, %s831_s20   ;;  %s951_s18 = smov %s827_s19 }
 0x170   : > { %p14_p8 = scmp.ge.s32.totalorder %s17_s20, 4   ;;  %s952_s19 = smov %s954_s22 }
 0x172   :  { %16 = sbr.rel (!%p14_p8) target bundleno = 3 (0x3), region = 90 }
 0x177   :  { %526 = vsyncpa [#allocation4], 1 }
 0x178   :  { %528 = vsyncpa [#allocation4 + $0x1], 1 }
 0x179   :  { %529 = vsyncpa [#allocation6], 1 }

</bundles_post_ra>
